<compile_context>
chip_gen: v5e
topology: v5e:2x2
jax: 0.10.0
libtpu: 0.0.40
codegen_flags: <defaults>
</compile_context>

<pallas_src>
import functools

import jax
import jax.numpy as jnp
from jax.experimental import pallas as pl
from jax.experimental.pallas import tpu as pltpu


def _round_up(x, m):
    return (x + m - 1) // m * m


def _rnn_recurrence_kernel(xp_ref, h0_ref, whh_ref, hid_ref, h_scratch, *, t_blk):
    """One grid step == T_BLK RNN time steps (time grid axis is sequential)."""

    @pl.when(pl.program_id(0) == 0)
    def _():
        h_scratch[...] = h0_ref[...].astype(h_scratch.dtype)

    h = h_scratch[...]                       # (B_p, H_p) f32, carried hidden state
    w_hh = whh_ref[...]                      # (H_p, H_p), resident in VMEM

    # Statically unrolled loop over the time block: only the recurrent matmul
    # and the relu stay on the serial chain (input/output projections hoisted).
    for step in range(t_blk):
        pre = xp_ref[step] + jnp.dot(h, w_hh, preferred_element_type=jnp.float32)
        h = jnp.maximum(pre, 0.0)            # activation == 'relu'
        # TODO(synk): for activation == 'tanh' use jnp.tanh(pre) here instead.
        hid_ref[step] = h.astype(hid_ref.dtype)

    h_scratch[...] = h                       # carry into the next time block


@jax.jit
def rnn_forward(input_signal, hidden, params):
    """input_signal: (B, T, n_in), hidden: (B, n_hid).

    Returns (hidden_list (B,T,n_hid), output_list (B,T,n_out), final hidden
    (B,n_hid)), matching RecurrentNeuralNetwork.forward with activation='relu'.
    """
    w_in, b_in, w_hh, b_hh, w_out, b_out = params
    B, T, n_in = input_signal.shape
    n_hid = w_in.shape[1]
    n_out = w_out.shape[1]
    dtype = input_signal.dtype

    T_BLK = 8                                 # timesteps per grid step
    B_p = _round_up(B, 8)                     # sublane multiple
    H_p = _round_up(n_hid, 128)               # lane multiple
    T_p = _round_up(T, T_BLK)

    # ---- Hoisted input projection: one big matmul for all timesteps, with the
    #      two biases folded in; time-major layout is fused into the einsum.
    bias = (b_in + b_hh).reshape(1, 1, n_hid).astype(jnp.float32)
    x_proj = jnp.einsum('bti,ih->tbh', input_signal, w_in,
                        preferred_element_type=jnp.float32) + bias   # (T, B, n_hid)
    x_proj = jnp.pad(x_proj, ((0, T_p - T), (0, B_p - B), (0, H_p - n_hid)))

    h0_p = jnp.pad(hidden.astype(jnp.float32),
                   ((0, B_p - B), (0, H_p - n_hid)))
    w_hh_p = jnp.pad(w_hh.astype(jnp.float32),
                     ((0, H_p - n_hid), (0, H_p - n_hid)))

    # NOTE: h0 / W_hh have constant index maps so they are DMA'd only once.  At
    # large n_hid you would additionally pass pipeline_mode=pl.Buffered(1) for
    # them, store W_hh in bf16, and set vmem_limit_bytes (v7x: 64 MiB/TC).
    grid_spec = pltpu.PrefetchScalarGridSpec(
        num_scalar_prefetch=0,
        grid=(T_p // T_BLK,),
        in_specs=[
            pl.BlockSpec((T_BLK, B_p, H_p), lambda t: (t, 0, 0)),   # pre-projected x
            pl.BlockSpec((B_p, H_p), lambda t: (0, 0)),             # h0
            pl.BlockSpec((H_p, H_p), lambda t: (0, 0)),             # W_hh
        ],
        out_specs=pl.BlockSpec((T_BLK, B_p, H_p), lambda t: (t, 0, 0)),
        scratch_shapes=[pltpu.VMEM((B_p, H_p), jnp.float32)],       # carried hidden
    )

    hid_tm = pl.pallas_call(
        functools.partial(_rnn_recurrence_kernel, t_blk=T_BLK),
        grid_spec=grid_spec,
        out_shape=jax.ShapeDtypeStruct((T_p, B_p, H_p), jnp.float32),
        compiler_params=pltpu.CompilerParams(
            dimension_semantics=("arbitrary",),   # time blocks are sequential
        ),
    )(x_proj, h0_p, w_hh_p)

    hid_tm = hid_tm[:T, :B, :n_hid]                         # unpad: (T, B, n_hid)

    # ---- Hoisted output projection: one big matmul; batch-major (B, T, n_out)
    #      comes directly out of the einsum (no materialized output transpose).
    output_list = (jnp.einsum('tbh,ho->bto', hid_tm, w_out,
                              preferred_element_type=jnp.float32)
                   + b_out.reshape(1, 1, n_out)).astype(dtype)

    hidden_list = jnp.transpose(hid_tm, (1, 0, 2)).astype(dtype)    # (B, T, n_hid)
    h_final = hidden_list[:, -1, :]                                  # (B, n_hid)
    return hidden_list, output_list, h_final


def init_params(key, n_in, n_hid, n_out, dtype=jnp.float32):
    """Deterministic nn.Linear-style init; weights stored as (in_features, out_features)."""
    ks = jax.random.split(key, 6)

    def linear(kw, kb, fan_in, fan_out):
        bound = 1.0 / jnp.sqrt(fan_in)
        w = jax.random.uniform(kw, (fan_in, fan_out), dtype, -bound, bound)
        b = jax.random.uniform(kb, (1, fan_out), dtype, -bound, bound)
        return w, b

    w_in, b_in = linear(ks[0], ks[1], n_in, n_hid)
    w_hh, b_hh = linear(ks[2], ks[3], n_hid, n_hid)
    w_out, b_out = linear(ks[4], ks[5], n_hid, n_out)
    return (w_in, b_in, w_hh, b_hh, w_out, b_out)


def rnn_reference(input_signal, hidden, params):
    """Pure-JAX reference mirroring the PyTorch loop (for a sanity check)."""
    w_in, b_in, w_hh, b_hh, w_out, b_out = params
    hs, os = [], []
    x_tm = jnp.transpose(input_signal, (1, 0, 2))
    for t in range(x_tm.shape[0]):
        pre = x_tm[t] @ w_in + b_in + hidden @ w_hh + b_hh
        hidden = jnp.maximum(pre, 0.0)
        os.append(hidden @ w_out + b_out)
        hs.append(hidden)
    return (jnp.stack(hs, axis=1), jnp.stack(os, axis=1), hidden)


if __name__ == "__main__":
    B, T, n_in, n_hid, n_out = 2, 8, 4, 32, 3
    key = jax.random.PRNGKey(0)
    k_x, k_h, k_p = jax.random.split(key, 3)

    x = jax.random.normal(k_x, (B, T, n_in), jnp.float32)
    h0 = jax.random.normal(k_h, (B, n_hid), jnp.float32)
    params = init_params(k_p, n_in, n_hid, n_out)

    hid_list, out_list, h_final = rnn_forward(x, h0, params)
    jax.block_until_ready((hid_list, out_list, h_final))

    # correctness check against pure-JAX reference
    ref_hid, ref_out, ref_h = rnn_reference(x, h0, params)
    assert jnp.allclose(hid_list, ref_hid, atol=1e-4, rtol=1e-4), "hidden_list mismatch"
    assert jnp.allclose(out_list, ref_out, atol=1e-4, rtol=1e-4), "output_list mismatch"
    assert jnp.allclose(h_final, ref_h, atol=1e-4, rtol=1e-4), "final hidden mismatch"

    assert hid_list.shape == (B, T, n_hid)
    assert out_list.shape == (B, T, n_out)
    assert h_final.shape == (B, n_hid)

    print("KERNEL_OK")
</pallas_src>

<mosaic_0001>
module attributes {stable_mosaic.version = 11 : i64} {
  func.func @_rnn_recurrence_kernel(%arg0: i32, %arg1: memref<8x8x128xf32, #tpu.memory_space<vmem>>, %arg2: memref<8x128xf32, #tpu.memory_space<vmem>>, %arg3: memref<128x128xf32, #tpu.memory_space<vmem>>, %arg4: memref<8x8x128xf32, #tpu.memory_space<vmem>>, %arg5: memref<8x128xf32, #tpu.memory_space<vmem>>) attributes {dimension_semantics = [#tpu.dimension_semantics<arbitrary>], iteration_bounds = array<i64: 1>, scalar_prefetch = 0 : i64, scratch_operands = 1 : i64, tpu.core_type = #tpu.core_type<tc>, window_params = [{transform_indices = @transform_0, window_bounds = array<i64: 8, 8, 128>}, {pipeline_mode = #tpu.pipeline_mode<synchronous>, transform_indices = @transform_1, window_bounds = array<i64: 8, 128>}, {pipeline_mode = #tpu.pipeline_mode<synchronous>, transform_indices = @transform_2, window_bounds = array<i64: 128, 128>}, {transform_indices = @transform_3, window_bounds = array<i64: 8, 8, 128>}]} {
    %c0_i32 = arith.constant 0 : i32
    %0 = arith.cmpi eq, %arg0, %c0_i32 : i32
    %1 = arith.extui %0 : i1 to i32
    %c0_i32_0 = arith.constant 0 : i32
    %2 = arith.cmpi ne, %1, %c0_i32_0 : i32
    scf.if %2 {
      %c0_62 = arith.constant 0 : index
      %c0_63 = arith.constant 0 : index
      %78 = vector.load %arg2[%c0_62, %c0_63] : memref<8x128xf32, #tpu.memory_space<vmem>>, vector<8x128xf32>
      %c0_64 = arith.constant 0 : index
      %c0_65 = arith.constant 0 : index
      %79 = vector.load %arg5[%c0_64, %c0_65] : memref<8x128xf32, #tpu.memory_space<vmem>>, vector<8x128xf32>
      tpu.vector_store %arg5[%c0_64, %c0_65], %78 {strides = array<i32>} : memref<8x128xf32, #tpu.memory_space<vmem>>, vector<8x128xf32>,
    } else {
    }
    %c0 = arith.constant 0 : index
    %c0_1 = arith.constant 0 : index
    %3 = vector.load %arg5[%c0, %c0_1] : memref<8x128xf32, #tpu.memory_space<vmem>>, vector<8x128xf32>
    %c0_2 = arith.constant 0 : index
    %c0_3 = arith.constant 0 : index
    %4 = vector.load %arg3[%c0_2, %c0_3] : memref<128x128xf32, #tpu.memory_space<vmem>>, vector<128x128xf32>
    %c0_4 = arith.constant 0 : index
    %c0_5 = arith.constant 0 : index
    %c0_6 = arith.constant 0 : index
    %5 = vector.load %arg1[%c0_4, %c0_5, %c0_6] : memref<8x8x128xf32, #tpu.memory_space<vmem>>, vector<1x8x128xf32>
    %6 = vector.shape_cast %5 : vector<1x8x128xf32> to vector<8x128xf32>
    %cst = arith.constant dense<0.000000e+00> : vector<8x128xf32>
    %7 = tpu.matmul %3, %4, %cst {dimension_numbers = #tpu.dot_dimension_numbers<[1], [0], [0], [1], [0, 0, 1, 1], [], []>} : vector<8x128xf32>, vector<128x128xf32>, vector<8x128xf32> -> vector<8x128xf32>
    %8 = arith.addf %6, %7 : vector<8x128xf32>
    %cst_7 = arith.constant 0.000000e+00 : f32
    %9 = vector.broadcast %cst_7 : f32 to vector<8x128xf32>
    %10 = arith.maximumf %8, %9 : vector<8x128xf32>
    %c0_8 = arith.constant 0 : index
    %c0_9 = arith.constant 0 : index
    %c0_10 = arith.constant 0 : index
    %11 = vector.load %arg4[%c0_8, %c0_9, %c0_10] : memref<8x8x128xf32, #tpu.memory_space<vmem>>, vector<1x8x128xf32>
    %12 = vector.shape_cast %11 : vector<1x8x128xf32> to vector<8x128xf32>
    %13 = vector.shape_cast %10 : vector<8x128xf32> to vector<1x8x128xf32>
    tpu.vector_store %arg4[%c0_8, %c0_9, %c0_10], %13 {strides = array<i32>} : memref<8x8x128xf32, #tpu.memory_space<vmem>>, vector<1x8x128xf32>,
    %c1 = arith.constant 1 : index
    %c0_11 = arith.constant 0 : index
    %c0_12 = arith.constant 0 : index
    %14 = vector.load %arg1[%c1, %c0_11, %c0_12] : memref<8x8x128xf32, #tpu.memory_space<vmem>>, vector<1x8x128xf32>
    %15 = vector.shape_cast %14 : vector<1x8x128xf32> to vector<8x128xf32>
    %cst_13 = arith.constant dense<0.000000e+00> : vector<8x128xf32>
    %16 = tpu.matmul %10, %4, %cst_13 {dimension_numbers = #tpu.dot_dimension_numbers<[1], [0], [0], [1], [0, 0, 1, 1], [], []>} : vector<8x128xf32>, vector<128x128xf32>, vector<8x128xf32> -> vector<8x128xf32>
    %17 = arith.addf %15, %16 : vector<8x128xf32>
    %cst_14 = arith.constant 0.000000e+00 : f32
    %18 = vector.broadcast %cst_14 : f32 to vector<8x128xf32>
    %19 = arith.maximumf %17, %18 : vector<8x128xf32>
    %c1_15 = arith.constant 1 : index
    %c0_16 = arith.constant 0 : index
    %c0_17 = arith.constant 0 : index
    %20 = vector.load %arg4[%c1_15, %c0_16, %c0_17] : memref<8x8x128xf32, #tpu.memory_space<vmem>>, vector<1x8x128xf32>
    %21 = vector.shape_cast %20 : vector<1x8x128xf32> to vector<8x128xf32>
    %22 = vector.shape_cast %19 : vector<8x128xf32> to vector<1x8x128xf32>
    tpu.vector_store %arg4[%c1_15, %c0_16, %c0_17], %22 {strides = array<i32>} : memref<8x8x128xf32, #tpu.memory_space<vmem>>, vector<1x8x128xf32>,
    %c2 = arith.constant 2 : index
    %c0_18 = arith.constant 0 : index
    %c0_19 = arith.constant 0 : index
    %23 = vector.load %arg1[%c2, %c0_18, %c0_19] : memref<8x8x128xf32, #tpu.memory_space<vmem>>, vector<1x8x128xf32>
    %24 = vector.shape_cast %23 : vector<1x8x128xf32> to vector<8x128xf32>
    %cst_20 = arith.constant dense<0.000000e+00> : vector<8x128xf32>
    %25 = tpu.matmul %19, %4, %cst_20 {dimension_numbers = #tpu.dot_dimension_numbers<[1], [0], [0], [1], [0, 0, 1, 1], [], []>} : vector<8x128xf32>, vector<128x128xf32>, vector<8x128xf32> -> vector<8x128xf32>
    %26 = arith.addf %24, %25 : vector<8x128xf32>
    %cst_21 = arith.constant 0.000000e+00 : f32
    %27 = vector.broadcast %cst_21 : f32 to vector<8x128xf32>
    %28 = arith.maximumf %26, %27 : vector<8x128xf32>
    %c2_22 = arith.constant 2 : index
    %c0_23 = arith.constant 0 : index
    %c0_24 = arith.constant 0 : index
    %29 = vector.load %arg4[%c2_22, %c0_23, %c0_24] : memref<8x8x128xf32, #tpu.memory_space<vmem>>, vector<1x8x128xf32>
    %30 = vector.shape_cast %29 : vector<1x8x128xf32> to vector<8x128xf32>
    %31 = vector.shape_cast %28 : vector<8x128xf32> to vector<1x8x128xf32>
    tpu.vector_store %arg4[%c2_22, %c0_23, %c0_24], %31 {strides = array<i32>} : memref<8x8x128xf32, #tpu.memory_space<vmem>>, vector<1x8x128xf32>,
    %c3 = arith.constant 3 : index
    %c0_25 = arith.constant 0 : index
    %c0_26 = arith.constant 0 : index
    %32 = vector.load %arg1[%c3, %c0_25, %c0_26] : memref<8x8x128xf32, #tpu.memory_space<vmem>>, vector<1x8x128xf32>
    %33 = vector.shape_cast %32 : vector<1x8x128xf32> to vector<8x128xf32>
    %cst_27 = arith.constant dense<0.000000e+00> : vector<8x128xf32>
    %34 = tpu.matmul %28, %4, %cst_27 {dimension_numbers = #tpu.dot_dimension_numbers<[1], [0], [0], [1], [0, 0, 1, 1], [], []>} : vector<8x128xf32>, vector<128x128xf32>, vector<8x128xf32> -> vector<8x128xf32>
    %35 = arith.addf %33, %34 : vector<8x128xf32>
    %cst_28 = arith.constant 0.000000e+00 : f32
    %36 = vector.broadcast %cst_28 : f32 to vector<8x128xf32>
    %37 = arith.maximumf %35, %36 : vector<8x128xf32>
    %c3_29 = arith.constant 3 : index
    %c0_30 = arith.constant 0 : index
    %c0_31 = arith.constant 0 : index
    %38 = vector.load %arg4[%c3_29, %c0_30, %c0_31] : memref<8x8x128xf32, #tpu.memory_space<vmem>>, vector<1x8x128xf32>
    %39 = vector.shape_cast %38 : vector<1x8x128xf32> to vector<8x128xf32>
    %40 = vector.shape_cast %37 : vector<8x128xf32> to vector<1x8x128xf32>
    tpu.vector_store %arg4[%c3_29, %c0_30, %c0_31], %40 {strides = array<i32>} : memref<8x8x128xf32, #tpu.memory_space<vmem>>, vector<1x8x128xf32>,
    %c4 = arith.constant 4 : index
    %c0_32 = arith.constant 0 : index
    %c0_33 = arith.constant 0 : index
    %41 = vector.load %arg1[%c4, %c0_32, %c0_33] : memref<8x8x128xf32, #tpu.memory_space<vmem>>, vector<1x8x128xf32>
    %42 = vector.shape_cast %41 : vector<1x8x128xf32> to vector<8x128xf32>
    %cst_34 = arith.constant dense<0.000000e+00> : vector<8x128xf32>
    %43 = tpu.matmul %37, %4, %cst_34 {dimension_numbers = #tpu.dot_dimension_numbers<[1], [0], [0], [1], [0, 0, 1, 1], [], []>} : vector<8x128xf32>, vector<128x128xf32>, vector<8x128xf32> -> vector<8x128xf32>
    %44 = arith.addf %42, %43 : vector<8x128xf32>
    %cst_35 = arith.constant 0.000000e+00 : f32
    %45 = vector.broadcast %cst_35 : f32 to vector<8x128xf32>
    %46 = arith.maximumf %44, %45 : vector<8x128xf32>
    %c4_36 = arith.constant 4 : index
    %c0_37 = arith.constant 0 : index
    %c0_38 = arith.constant 0 : index
    %47 = vector.load %arg4[%c4_36, %c0_37, %c0_38] : memref<8x8x128xf32, #tpu.memory_space<vmem>>, vector<1x8x128xf32>
    %48 = vector.shape_cast %47 : vector<1x8x128xf32> to vector<8x128xf32>
    %49 = vector.shape_cast %46 : vector<8x128xf32> to vector<1x8x128xf32>
    tpu.vector_store %arg4[%c4_36, %c0_37, %c0_38], %49 {strides = array<i32>} : memref<8x8x128xf32, #tpu.memory_space<vmem>>, vector<1x8x128xf32>,
    %c5 = arith.constant 5 : index
    %c0_39 = arith.constant 0 : index
    %c0_40 = arith.constant 0 : index
    %50 = vector.load %arg1[%c5, %c0_39, %c0_40] : memref<8x8x128xf32, #tpu.memory_space<vmem>>, vector<1x8x128xf32>
    %51 = vector.shape_cast %50 : vector<1x8x128xf32> to vector<8x128xf32>
    %cst_41 = arith.constant dense<0.000000e+00> : vector<8x128xf32>
    %52 = tpu.matmul %46, %4, %cst_41 {dimension_numbers = #tpu.dot_dimension_numbers<[1], [0], [0], [1], [0, 0, 1, 1], [], []>} : vector<8x128xf32>, vector<128x128xf32>, vector<8x128xf32> -> vector<8x128xf32>
    %53 = arith.addf %51, %52 : vector<8x128xf32>
    %cst_42 = arith.constant 0.000000e+00 : f32
    %54 = vector.broadcast %cst_42 : f32 to vector<8x128xf32>
    %55 = arith.maximumf %53, %54 : vector<8x128xf32>
    %c5_43 = arith.constant 5 : index
    %c0_44 = arith.constant 0 : index
    %c0_45 = arith.constant 0 : index
    %56 = vector.load %arg4[%c5_43, %c0_44, %c0_45] : memref<8x8x128xf32, #tpu.memory_space<vmem>>, vector<1x8x128xf32>
    %57 = vector.shape_cast %56 : vector<1x8x128xf32> to vector<8x128xf32>
    %58 = vector.shape_cast %55 : vector<8x128xf32> to vector<1x8x128xf32>
    tpu.vector_store %arg4[%c5_43, %c0_44, %c0_45], %58 {strides = array<i32>} : memref<8x8x128xf32, #tpu.memory_space<vmem>>, vector<1x8x128xf32>,
    %c6 = arith.constant 6 : index
    %c0_46 = arith.constant 0 : index
    %c0_47 = arith.constant 0 : index
    %59 = vector.load %arg1[%c6, %c0_46, %c0_47] : memref<8x8x128xf32, #tpu.memory_space<vmem>>, vector<1x8x128xf32>
    %60 = vector.shape_cast %59 : vector<1x8x128xf32> to vector<8x128xf32>
    %cst_48 = arith.constant dense<0.000000e+00> : vector<8x128xf32>
    %61 = tpu.matmul %55, %4, %cst_48 {dimension_numbers = #tpu.dot_dimension_numbers<[1], [0], [0], [1], [0, 0, 1, 1], [], []>} : vector<8x128xf32>, vector<128x128xf32>, vector<8x128xf32> -> vector<8x128xf32>
    %62 = arith.addf %60, %61 : vector<8x128xf32>
    %cst_49 = arith.constant 0.000000e+00 : f32
    %63 = vector.broadcast %cst_49 : f32 to vector<8x128xf32>
    %64 = arith.maximumf %62, %63 : vector<8x128xf32>
    %c6_50 = arith.constant 6 : index
    %c0_51 = arith.constant 0 : index
    %c0_52 = arith.constant 0 : index
    %65 = vector.load %arg4[%c6_50, %c0_51, %c0_52] : memref<8x8x128xf32, #tpu.memory_space<vmem>>, vector<1x8x128xf32>
    %66 = vector.shape_cast %65 : vector<1x8x128xf32> to vector<8x128xf32>
    %67 = vector.shape_cast %64 : vector<8x128xf32> to vector<1x8x128xf32>
    tpu.vector_store %arg4[%c6_50, %c0_51, %c0_52], %67 {strides = array<i32>} : memref<8x8x128xf32, #tpu.memory_space<vmem>>, vector<1x8x128xf32>,
    %c7 = arith.constant 7 : index
    %c0_53 = arith.constant 0 : index
    %c0_54 = arith.constant 0 : index
    %68 = vector.load %arg1[%c7, %c0_53, %c0_54] : memref<8x8x128xf32, #tpu.memory_space<vmem>>, vector<1x8x128xf32>
    %69 = vector.shape_cast %68 : vector<1x8x128xf32> to vector<8x128xf32>
    %cst_55 = arith.constant dense<0.000000e+00> : vector<8x128xf32>
    %70 = tpu.matmul %64, %4, %cst_55 {dimension_numbers = #tpu.dot_dimension_numbers<[1], [0], [0], [1], [0, 0, 1, 1], [], []>} : vector<8x128xf32>, vector<128x128xf32>, vector<8x128xf32> -> vector<8x128xf32>
    %71 = arith.addf %69, %70 : vector<8x128xf32>
    %cst_56 = arith.constant 0.000000e+00 : f32
    %72 = vector.broadcast %cst_56 : f32 to vector<8x128xf32>
    %73 = arith.maximumf %71, %72 : vector<8x128xf32>
    %c7_57 = arith.constant 7 : index
    %c0_58 = arith.constant 0 : index
    %c0_59 = arith.constant 0 : index
    %74 = vector.load %arg4[%c7_57, %c0_58, %c0_59] : memref<8x8x128xf32, #tpu.memory_space<vmem>>, vector<1x8x128xf32>
    %75 = vector.shape_cast %74 : vector<1x8x128xf32> to vector<8x128xf32>
    %76 = vector.shape_cast %73 : vector<8x128xf32> to vector<1x8x128xf32>
    tpu.vector_store %arg4[%c7_57, %c0_58, %c0_59], %76 {strides = array<i32>} : memref<8x8x128xf32, #tpu.memory_space<vmem>>, vector<1x8x128xf32>,
    %c0_60 = arith.constant 0 : index
    %c0_61 = arith.constant 0 : index
    %77 = vector.load %arg5[%c0_60, %c0_61] : memref<8x128xf32, #tpu.memory_space<vmem>>, vector<8x128xf32>
    tpu.vector_store %arg5[%c0_60, %c0_61], %73 {strides = array<i32>} : memref<8x128xf32, #tpu.memory_space<vmem>>, vector<8x128xf32>,
    return
  }
  func.func @transform_0(%arg0: i32) -> (i32, i32, i32) {
    %c0_i32 = arith.constant 0 : i32
    %c0_i32_0 = arith.constant 0 : i32
    %c0_i32_1 = arith.constant 0 : i32
    return %arg0, %c0_i32, %c0_i32_0 : i32, i32, i32
  }
  func.func @transform_1(%arg0: i32) -> (i32, i32) {
    %c0_i32 = arith.constant 0 : i32
    %c0_i32_0 = arith.constant 0 : i32
    %c0_i32_1 = arith.constant 0 : i32
    return %c0_i32, %c0_i32_0 : i32, i32
  }
  func.func @transform_2(%arg0: i32) -> (i32, i32) {
    %c0_i32 = arith.constant 0 : i32
    %c0_i32_0 = arith.constant 0 : i32
    %c0_i32_1 = arith.constant 0 : i32
    return %c0_i32, %c0_i32_0 : i32, i32
  }
  func.func @transform_3(%arg0: i32) -> (i32, i32, i32) {
    %c0_i32 = arith.constant 0 : i32
    %c0_i32_0 = arith.constant 0 : i32
    %c0_i32_1 = arith.constant 0 : i32
    return %arg0, %c0_i32, %c0_i32_0 : i32, i32, i32
  }
}

</mosaic_0001>

<bundles_post_ra>
// kernel: rnn_forward.1
= control target key start
LH: loop header
LB: loop body
LE: loop exit
PB: predicated region body
PF: predicated region fallthrough
CT: control target
= control target key end

     0   :  { %s541_s2 = inlined_call_operand.vmem [shape: f32[128,128], index: 2, kind: input, shape index: {}]   ;;  %s542_s1 = inlined_call_operand.vmem [shape: f32[8,128], index: 1, kind: input, shape index: {}]   ;;  %s543_s0 = inlined_call_operand.vmem [shape: f32[8,8,128], index: 0, kind: input, shape index: {}]   ;;  %s544_s3 = inlined_call_operand.vmem [shape: f32[8,8,128], index: 3, kind: output, shape index: {}]  }
   0x1   :  { %v285_v0 = vld [vmem:[%s541_s2 + $0x78] sm:$0xff]  ;;  %v290_v1 = vld [vmem:[%s541_s2 + $0x70] sm:$0xff]  ;;  %v297_v2 = vld [vmem:[%s541_s2 + $0x68] sm:$0xff] }
   0x2   :  { %38 = vmatpush.msra.mxu0 %v285_v0  ;;  %63 = vmatpush.msra.mxu1 %v285_v0  ;;  %v306_v3 = vld [vmem:[%s541_s2 + $0x60] sm:$0xff]  ;;  %v315_v4 = vld [vmem:[%s541_s2 + $0x58] sm:$0xff]  ;;  %v324_v5 = vld [vmem:[%s541_s2 + $0x50] sm:$0xff] }
   0x3   :  { %89 = vmatpush.msra.mxu2 %v285_v0  ;;  %115 = vmatpush.msra.mxu3 %v285_v0  ;;  %v333_v6 = vld [vmem:[%s541_s2 + $0x48] sm:$0xff]  ;;  %v342_v7 = vld [vmem:[%s541_s2 + $0x40] sm:$0xff]  ;;  %v351_v8 = vld [vmem:[%s541_s2 + $0x38] sm:$0xff] }
   0x4   :  { %39 = vmatpush.msra.mxu0 %v290_v1  ;;  %64 = vmatpush.msra.mxu1 %v290_v1  ;;  %v360_v9 = vld [vmem:[%s541_s2 + $0x30] sm:$0xff]  ;;  %v369_v10 = vld [vmem:[%s541_s2 + $0x28] sm:$0xff]  ;;  %v378_v11 = vld [vmem:[%s541_s2 + $0x20] sm:$0xff] }
   0x5   :  { %90 = vmatpush.msra.mxu2 %v290_v1  ;;  %116 = vmatpush.msra.mxu3 %v290_v1  ;;  %v387_v12 = vld [vmem:[%s541_s2 + $0x18] sm:$0xff]  ;;  %v396_v13 = vld [vmem:[%s541_s2 + $0x10] sm:$0xff]  ;;  %v405_v14 = vld [vmem:[%s541_s2 + $0x8] sm:$0xff] }
   0x6   :  { %40 = vmatpush.msra.mxu0 %v297_v2  ;;  %65 = vmatpush.msra.mxu1 %v297_v2  ;;  %v414_v15 = vld [vmem:[%s541_s2] sm:$0xff]  ;;  %v248_v21 = vld [vmem:[%s543_s0 + $0x8] sm:$0xff]  ;;  %v250_v25 = vld [vmem:[%s543_s0 + $0x10] sm:$0xff] }
   0x7   :  { %91 = vmatpush.msra.mxu2 %v297_v2  ;;  %117 = vmatpush.msra.mxu3 %v297_v2  ;;  %v18_v16 = vld [vmem:[%s542_s1] sm:$0xff]  ;;  %v252_v29 = vld [vmem:[%s543_s0 + $0x18] sm:$0xff]  ;;  %v256_v37 = vld [vmem:[%s543_s0 + $0x28] sm:$0xff] }
   0x8   :  { %41 = vmatpush.msra.mxu0 %v306_v3  ;;  %66 = vmatpush.msra.mxu1 %v306_v3  ;;  %v37_v17 = vld [vmem:[%s543_s0] sm:$0xff]  ;;  %v258_v41 = vld [vmem:[%s543_s0 + $0x30] sm:$0xff]  ;;  %v260_v45 = vld [vmem:[%s543_s0 + $0x38] sm:$0xff] }
   0x9   :  { %92 = vmatpush.msra.mxu2 %v306_v3  ;;  %118 = vmatpush.msra.mxu3 %v306_v3  ;;  %v254_v33 = vld [vmem:[%s543_s0 + $0x20] sm:$0xff] }
   0xa   :  { %42 = vmatpush.msra.mxu0 %v315_v4  ;;  %67 = vmatpush.msra.mxu1 %v315_v4 }
   0xb   :  { %93 = vmatpush.msra.mxu2 %v315_v4  ;;  %119 = vmatpush.msra.mxu3 %v315_v4 }
   0xc   :  { %43 = vmatpush.msra.mxu0 %v324_v5  ;;  %68 = vmatpush.msra.mxu1 %v324_v5 }
   0xd   :  { %94 = vmatpush.msra.mxu2 %v324_v5  ;;  %120 = vmatpush.msra.mxu3 %v324_v5 }
   0xe   :  { %44 = vmatpush.msra.mxu0 %v333_v6  ;;  %69 = vmatpush.msra.mxu1 %v333_v6 }
   0xf   :  { %95 = vmatpush.msra.mxu2 %v333_v6  ;;  %121 = vmatpush.msra.mxu3 %v333_v6 }
  0x10   :  { %45 = vmatpush.msra.mxu0 %v342_v7  ;;  %70 = vmatpush.msra.mxu1 %v342_v7 }
  0x11   :  { %96 = vmatpush.msra.mxu2 %v342_v7  ;;  %122 = vmatpush.msra.mxu3 %v342_v7 }
  0x12   :  { %46 = vmatpush.msra.mxu0 %v351_v8  ;;  %71 = vmatpush.msra.mxu1 %v351_v8 }
  0x13   :  { %97 = vmatpush.msra.mxu2 %v351_v8  ;;  %123 = vmatpush.msra.mxu3 %v351_v8 }
  0x14   :  { %47 = vmatpush.msra.mxu0 %v360_v9  ;;  %72 = vmatpush.msra.mxu1 %v360_v9 }
  0x15   :  { %98 = vmatpush.msra.mxu2 %v360_v9  ;;  %124 = vmatpush.msra.mxu3 %v360_v9 }
  0x16   :  { %48 = vmatpush.msra.mxu0 %v369_v10  ;;  %73 = vmatpush.msra.mxu1 %v369_v10 }
  0x17   :  { %99 = vmatpush.msra.mxu2 %v369_v10  ;;  %125 = vmatpush.msra.mxu3 %v369_v10 }
  0x18   :  { %49 = vmatpush.msra.mxu0 %v378_v11  ;;  %74 = vmatpush.msra.mxu1 %v378_v11 }
  0x19   :  { %100 = vmatpush.msra.mxu2 %v378_v11  ;;  %126 = vmatpush.msra.mxu3 %v378_v11 }
  0x1a   :  { %50 = vmatpush.msra.mxu0 %v387_v12  ;;  %75 = vmatpush.msra.mxu1 %v387_v12 }
  0x1b   :  { %101 = vmatpush.msra.mxu2 %v387_v12  ;;  %127 = vmatpush.msra.mxu3 %v387_v12 }
  0x1c   :  { %51 = vmatpush.msra.mxu0 %v396_v13  ;;  %76 = vmatpush.msra.mxu1 %v396_v13 }
  0x1d   :  { %102 = vmatpush.msra.mxu2 %v396_v13  ;;  %128 = vmatpush.msra.mxu3 %v396_v13 }
  0x1e   :  { %52 = vmatpush.msra.mxu0 %v405_v14  ;;  %77 = vmatpush.msra.mxu1 %v405_v14 }
  0x1f   :  { %103 = vmatpush.msra.mxu2 %v405_v14  ;;  %129 = vmatpush.msra.mxu3 %v405_v14 }
  0x20   :  { %53 = vmatpush.msra.mxu0 %v414_v15  ;;  %78 = vmatpush.msra.mxu1 %v414_v15 }
  0x21   :  { %54 = vmatmul.f32.vlgmr.msra.gmra.mxu0 %v18_v16  ;;  %104 = vmatpush.msra.mxu2 %v414_v15 }
  0x22   :  { %130 = vmatpush.msra.mxu3 %v414_v15  ;;  %141 = vmatpush.msrb.mxu0 %v285_v0 }
  0x23   :  { %167 = vmatpush.msrb.mxu1 %v285_v0  ;;  %193 = vmatpush.msrb.mxu2 %v285_v0 }
  0x24   :  { %142 = vmatpush.msrb.mxu0 %v290_v1  ;;  %219 = vmatpush.msrb.mxu3 %v285_v0 }
  0x25   :  { %168 = vmatpush.msrb.mxu1 %v290_v1  ;;  %194 = vmatpush.msrb.mxu2 %v290_v1 }
  0x26   :  { %143 = vmatpush.msrb.mxu0 %v297_v2  ;;  %220 = vmatpush.msrb.mxu3 %v290_v1 }
  0x27   :  { %169 = vmatpush.msrb.mxu1 %v297_v2  ;;  %195 = vmatpush.msrb.mxu2 %v297_v2 }
  0x28   :  { %144 = vmatpush.msrb.mxu0 %v306_v3  ;;  %221 = vmatpush.msrb.mxu3 %v297_v2 }
  0x29   :  { %170 = vmatpush.msrb.mxu1 %v306_v3  ;;  %196 = vmatpush.msrb.mxu2 %v306_v3 }
  0x2a   :  { %145 = vmatpush.msrb.mxu0 %v315_v4  ;;  %222 = vmatpush.msrb.mxu3 %v306_v3 }
  0x2b   :  { %171 = vmatpush.msrb.mxu1 %v315_v4  ;;  %197 = vmatpush.msrb.mxu2 %v315_v4 }
  0x2c   :  { %146 = vmatpush.msrb.mxu0 %v324_v5  ;;  %223 = vmatpush.msrb.mxu3 %v315_v4 }
  0x2d   :  { %172 = vmatpush.msrb.mxu1 %v324_v5  ;;  %198 = vmatpush.msrb.mxu2 %v324_v5 }
  0x2e   :  { %147 = vmatpush.msrb.mxu0 %v333_v6  ;;  %224 = vmatpush.msrb.mxu3 %v324_v5 }
  0x2f   :  { %173 = vmatpush.msrb.mxu1 %v333_v6  ;;  %199 = vmatpush.msrb.mxu2 %v333_v6 }
  0x30   :  { %148 = vmatpush.msrb.mxu0 %v342_v7  ;;  %225 = vmatpush.msrb.mxu3 %v333_v6 }
  0x31   :  { %174 = vmatpush.msrb.mxu1 %v342_v7  ;;  %200 = vmatpush.msrb.mxu2 %v342_v7 }
  0x32   :  { %149 = vmatpush.msrb.mxu0 %v351_v8  ;;  %226 = vmatpush.msrb.mxu3 %v342_v7 }
  0x33   :  { %175 = vmatpush.msrb.mxu1 %v351_v8  ;;  %201 = vmatpush.msrb.mxu2 %v351_v8 }
  0x34   :  { %150 = vmatpush.msrb.mxu0 %v360_v9  ;;  %227 = vmatpush.msrb.mxu3 %v351_v8 }
  0x35   :  { %176 = vmatpush.msrb.mxu1 %v360_v9  ;;  %202 = vmatpush.msrb.mxu2 %v360_v9 }
  0x36   :  { %151 = vmatpush.msrb.mxu0 %v369_v10  ;;  %228 = vmatpush.msrb.mxu3 %v360_v9 }
  0x37   :  { %177 = vmatpush.msrb.mxu1 %v369_v10  ;;  %203 = vmatpush.msrb.mxu2 %v369_v10 }
  0x38   :  { %152 = vmatpush.msrb.mxu0 %v378_v11  ;;  %229 = vmatpush.msrb.mxu3 %v369_v10 }
  0x39   :  { %178 = vmatpush.msrb.mxu1 %v378_v11  ;;  %204 = vmatpush.msrb.mxu2 %v378_v11 }
  0x3a   :  { %153 = vmatpush.msrb.mxu0 %v387_v12  ;;  %230 = vmatpush.msrb.mxu3 %v378_v11 }
  0x3b   :  { %179 = vmatpush.msrb.mxu1 %v387_v12  ;;  %205 = vmatpush.msrb.mxu2 %v387_v12 }
  0x3c   :  { %154 = vmatpush.msrb.mxu0 %v396_v13  ;;  %231 = vmatpush.msrb.mxu3 %v387_v12 }
  0x3d   :  { %180 = vmatpush.msrb.mxu1 %v396_v13  ;;  %206 = vmatpush.msrb.mxu2 %v396_v13 }
  0x3e   :  { %155 = vmatpush.msrb.mxu0 %v405_v14  ;;  %232 = vmatpush.msrb.mxu3 %v396_v13 }
  0x3f   :  { %181 = vmatpush.msrb.mxu1 %v405_v14  ;;  %207 = vmatpush.msrb.mxu2 %v405_v14 }
  0x40   :  { %156 = vmatpush.msrb.mxu0 %v414_v15  ;;  %233 = vmatpush.msrb.mxu3 %v405_v14 }
  0x41   :  { %182 = vmatpush.msrb.mxu1 %v414_v15  ;;  %208 = vmatpush.msrb.mxu2 %v414_v15 }
  0x42   :  { %234 = vmatpush.msrb.mxu3 %v414_v15 }
  0x9e   :  { %v55_v18 = vpop.f32.mrf.mxu0 }
  0x9f   :  { %v58_v19 = vadd.f32 %v55_v18, %v37_v17 }
  0xa1   :  { %v59_v20 = vmax.f32 %v58_v19, 0.0 }
  0xa3   :  { %60 = vst [vmem:[%s544_s3] sm:$0xff] %v59_v20  ;;  %79 = vmatmul.f32.vlgmr.msra.gmra.mxu1 %v59_v20 }
 0x120   :  { %v80_v22 = vpop.f32.mrf.mxu1 }
 0x121   :  { %v83_v23 = vadd.f32 %v248_v21, %v80_v22 }
 0x123   :  { %v84_v24 = vmax.f32 %v83_v23, 0.0 }
 0x125   :  { %249 = vst [vmem:[%s544_s3 + $0x8] sm:$0xff] %v84_v24  ;;  %105 = vmatmul.f32.vlgmr.msra.gmra.mxu2 %v84_v24 }
 0x1a8   :  { %v106_v26 = vpop.f32.mrf.mxu2 }
 0x1a9   :  { %v109_v27 = vadd.f32 %v250_v25, %v106_v26 }
 0x1ab   :  { %v110_v28 = vmax.f32 %v109_v27, 0.0 }
 0x1ad   :  { %251 = vst [vmem:[%s544_s3 + $0x10] sm:$0xff] %v110_v28  ;;  %131 = vmatmul.f32.vlgmr.msra.gmra.mxu3 %v110_v28 }
 0x230   :  { %v132_v30 = vpop.f32.mrf.mxu3 }
 0x231   :  { %v135_v31 = vadd.f32 %v252_v29, %v132_v30 }
 0x233   :  { %v136_v32 = vmax.f32 %v135_v31, 0.0 }
 0x235   :  { %253 = vst [vmem:[%s544_s3 + $0x18] sm:$0xff] %v136_v32  ;;  %157 = vmatmul.f32.vlgmr.msrb.gmra.mxu0 %v136_v32 }
 0x2b2   :  { %v158_v34 = vpop.f32.mrf.mxu0 }
 0x2b3   :  { %v161_v35 = vadd.f32 %v254_v33, %v158_v34 }
 0x2b5   :  { %v162_v36 = vmax.f32 %v161_v35, 0.0 }
 0x2b7   :  { %255 = vst [vmem:[%s544_s3 + $0x20] sm:$0xff] %v162_v36  ;;  %183 = vmatmul.f32.vlgmr.msrb.gmra.mxu1 %v162_v36 }
 0x334   :  { %v184_v38 = vpop.f32.mrf.mxu1 }
 0x335   :  { %v187_v39 = vadd.f32 %v256_v37, %v184_v38 }
 0x337   :  { %v188_v40 = vmax.f32 %v187_v39, 0.0 }
 0x339   :  { %257 = vst [vmem:[%s544_s3 + $0x28] sm:$0xff] %v188_v40  ;;  %209 = vmatmul.f32.vlgmr.msrb.gmra.mxu2 %v188_v40 }
 0x3bc   :  { %v210_v42 = vpop.f32.mrf.mxu2 }
 0x3bd   :  { %v213_v43 = vadd.f32 %v258_v41, %v210_v42 }
 0x3bf   :  { %v214_v44 = vmax.f32 %v213_v43, 0.0 }
 0x3c1   :  { %259 = vst [vmem:[%s544_s3 + $0x30] sm:$0xff] %v214_v44  ;;  %235 = vmatmul.f32.vlgmr.msrb.gmra.mxu3 %v214_v44 }
 0x444   :  { %v236_v46 = vpop.f32.mrf.mxu3 }
 0x445   :  { %v239_v47 = vadd.f32 %v260_v45, %v236_v46 }
 0x447   :  { %v240_v48 = vmax.f32 %v239_v47, 0.0 }
 0x449   :  { %261 = vst [vmem:[%s544_s3 + $0x38] sm:$0xff] %v240_v48 }

</bundles_post_ra>
